<compile_context>
chip_gen: v7x
topology: tpu7x:2x2x1
jax: 0.10.0
libtpu: 0.0.40
codegen_flags: <defaults>
</compile_context>

<pallas_src>
import functools

import jax
import jax.numpy as jnp
from jax.experimental import pallas as pl
from jax.experimental.pallas import tpu as pltpu


def _round_up(v, m):
    return ((v + m - 1) // m) * m


def _tpu_kind():
    try:
        return jax.devices()[0].device_kind.lower()
    except Exception:
        return ""


def select_config():
    """Per-generation choices:
       v5e : f32 elementwise (no bf16 VALU), tile cap 2048, single TC.
       v6e : bf16 inter-layer activations, tile cap 4096, single TC.
       v7x : bf16 activations, tile cap 4096, and >= 2 grid steps so the
             "parallel" batch axis is sharded across both TensorCores.
    Returns (act_dtype, tile_cap, split_across_tensorcores)."""
    kind = _tpu_kind()
    is_v5 = "v5" in kind
    is_v7 = ("v7" in kind) or ("7x" in kind)
    act_dtype = jnp.float32 if is_v5 else jnp.bfloat16
    tile_cap = 2048 if is_v5 else 4096
    return act_dtype, tile_cap, is_v7


def _mlp_kernel(x_ref, w_ref, b_ref, o_ref, *, act_dtype):
    """MinNN forward on transposed activations: h is (features, TILE_B).

    w_ref: (7, H, H) bf16 -- slice 0 holds W1 in cols 0:2, slices 1..5 hold
           W2..W6, slice 6 holds W7 in row 0 (rest zero).
    b_ref: (H, 7) f32     -- cols 0..5 = b1..b6, b7 stored at [0, 6].
    """
    x = x_ref[...]                                    # (2, TILE_B) f32
    b = b_ref[...]                                    # (H, 7)      f32

    # fc1: K=2 contraction -> VPU (avoid a >98%-padded MXU systolic pass).
    w1 = w_ref[0][:, 0:2].astype(jnp.float32)         # (H, 2)
    h = w1[:, 0:1] * x[0:1, :] + w1[:, 1:2] * x[1:2, :] + b[:, 0:1]
    h = jnp.maximum(h, 0.0).astype(act_dtype)         # (H, TILE_B)

    # fc2..fc6: bf16 x bf16 on the MXU with f32 accumulation; bias-add + ReLU
    # run in act_dtype (bf16 on v6e/v7x -> half the live vreg footprint of h).
    for i in range(1, 6):
        w = w_ref[i]                                  # (H, H) bf16
        acc = jnp.dot(w, h.astype(w.dtype), preferred_element_type=jnp.float32)
        bias = b[:, i:i + 1].astype(act_dtype)        # (H, 1)
        h = jnp.maximum(acc.astype(act_dtype) + bias, 0)

    # fc7: (1, H) @ (H, TILE_B) -> (1, TILE_B): lane-dense output store.
    w7 = w_ref[6][0:1, :]                             # (1, H) bf16
    out = jnp.dot(w7, h.astype(w7.dtype), preferred_element_type=jnp.float32)
    o_ref[...] = (out + b[0:1, 6:7]).astype(o_ref.dtype)


def pack_params(params):
    """Pack the 7 (W [out,in], b [out,1]) pairs into two constant operands."""
    H = params[1][0].shape[0]
    w_pack = jnp.zeros((7, H, H), jnp.bfloat16)
    w_pack = w_pack.at[0, :, 0:2].set(params[0][0].astype(jnp.bfloat16))
    for i in range(1, 6):
        w_pack = w_pack.at[i].set(params[i][0].astype(jnp.bfloat16))
    w_pack = w_pack.at[6, 0:1, :].set(params[6][0].astype(jnp.bfloat16))

    b_pack = jnp.zeros((H, 7), jnp.float32)
    for i in range(6):
        b_pack = b_pack.at[:, i].set(params[i][1][:, 0].astype(jnp.float32))
    b_pack = b_pack.at[0, 6].set(params[6][1][0, 0].astype(jnp.float32))
    return w_pack, b_pack


def min_nn_forward(x, params, *, tile_b=None, act_dtype=None):
    """x: [B, 2]. params: [(W [out,in], b [out,1]) f32] for fc1..fc7. -> [B, 1]."""
    cfg_act, cfg_tile, split_tc = select_config()
    if act_dtype is None:
        act_dtype = cfg_act
    if tile_b is None:
        tile_b = cfg_tile

    B = x.shape[0]
    H = params[1][0].shape[0]

    # TODO(synk): the wrapper-side x transpose (and the trivial out reshape)
    # is one extra small XLA copy; batch-minor callers could pass (2, B).
    x_t = x.astype(jnp.float32).T                     # (2, B): batch on lanes

    # Batch tiling: lane axis padded to a multiple of 128.  On v7x guarantee
    # >= 2 grid steps (when possible) so both TensorCores get batch tiles.
    if B <= tile_b:
        bp = max(128, _round_up(B, 128))
        if split_tc and bp >= 256:
            tile = _round_up(pl.cdiv(bp, 2), 128)
            bp = 2 * tile
        else:
            tile = bp
    else:
        tile = tile_b
        bp = _round_up(B, tile)
    if bp != B:
        x_t = jnp.pad(x_t, ((0, 0), (0, bp - B)))

    w_pack, b_pack = pack_params(params)

    # Two packed constants (not 15 tiny ones): full-array blocks with constant
    # index_maps -> single DMA each, resident in VMEM across all grid steps.
    in_specs = [
        pl.BlockSpec((2, tile), lambda i: (0, i)),
        pl.BlockSpec(w_pack.shape, lambda i: (0, 0, 0)),
        pl.BlockSpec(b_pack.shape, lambda i: (0, 0)),
    ]
    out_spec = pl.BlockSpec((1, tile), lambda i: (0, i))

    flops = 2 * bp * (2 * H + 5 * H * H + H)
    bytes_accessed = (x_t.size * 4 + int(w_pack.size) * 2
                      + int(b_pack.size) * 4 + bp * 4)

    kernel = functools.partial(_mlp_kernel, act_dtype=act_dtype)
    out_t = pl.pallas_call(
        kernel,
        out_shape=jax.ShapeDtypeStruct((1, bp), jnp.float32),
        grid=(bp // tile,),
        in_specs=in_specs,
        out_specs=out_spec,
        compiler_params=pltpu.CompilerParams(
            dimension_semantics=("parallel",),        # batch tiles across TCs (v7x)
            vmem_limit_bytes=8 * 1024 * 1024,         # footprint << 1 MiB; keep headroom
        ),
        cost_estimate=pl.CostEstimate(flops=flops, transcendentals=0,
                                      bytes_accessed=bytes_accessed),
    )(x_t, w_pack, b_pack)

    return out_t[:, :B].T                             # (B, 1)


def init_params(hidden_dim, key):
    """PyTorch nn.Linear-shaped params: W [out, in], b [out, 1], both f32."""
    dims = [(hidden_dim, 2)] + [(hidden_dim, hidden_dim)] * 5 + [(1, hidden_dim)]
    params = []
    for fan_out, fan_in in dims:
        key, kw, kb = jax.random.split(key, 3)
        bound = 1.0 / (fan_in ** 0.5)
        w = jax.random.uniform(kw, (fan_out, fan_in), jnp.float32, -bound, bound)
        b = jax.random.uniform(kb, (fan_out, 1), jnp.float32, -bound, bound)
        params.append((w, b))
    return params


def reference_forward(x, params, act_dtype):
    """Pure-JAX reference mirroring the kernel's dtypes exactly
    (bf16 weights, f32 MXU accumulation, act_dtype bias-add/ReLU)."""
    xt = x.astype(jnp.float32).T                      # (2, B)
    w1 = params[0][0].astype(jnp.bfloat16).astype(jnp.float32)
    b1 = params[0][1].astype(jnp.float32)
    h = w1[:, 0:1] * xt[0:1, :] + w1[:, 1:2] * xt[1:2, :] + b1
    h = jnp.maximum(h, 0.0).astype(act_dtype)
    for w, bb in params[1:6]:
        wb = w.astype(jnp.bfloat16)
        acc = jnp.dot(wb, h.astype(jnp.bfloat16), preferred_element_type=jnp.float32)
        h = jnp.maximum(acc.astype(act_dtype) + bb.astype(act_dtype), 0)
    w7 = params[6][0].astype(jnp.bfloat16)
    b7 = params[6][1].astype(jnp.float32)
    out = jnp.dot(w7, h.astype(jnp.bfloat16),
                  preferred_element_type=jnp.float32) + b7
    return out.T                                      # (B, 1)


if __name__ == "__main__":
    hidden_dim = 32
    batch = 8

    key = jax.random.PRNGKey(0)
    key, kx = jax.random.split(key)
    x = jax.random.normal(kx, (batch, 2), jnp.float32)
    params = init_params(hidden_dim, key)

    act_dtype, _, _ = select_config()
    out = jax.block_until_ready(min_nn_forward(x, params))
    ref = reference_forward(x, params, act_dtype)

    assert out.shape == (batch, 1)
    assert jnp.allclose(out, ref, atol=1e-2, rtol=1e-2), \
        float(jnp.max(jnp.abs(out - ref)))

    print("KERNEL_OK")
</pallas_src>

<mosaic_0001>
module attributes {stable_mosaic.version = 11 : i64} {
  func.func @_mlp_kernel(%arg0: i32, %arg1: memref<2x128xf32, #tpu.memory_space<vmem>>, %arg2: memref<7x32x32xbf16, #tpu.memory_space<vmem>>, %arg3: memref<32x7xf32, #tpu.memory_space<vmem>>, %arg4: memref<1x128xf32, #tpu.memory_space<vmem>>) attributes {dimension_semantics = [#tpu.dimension_semantics<parallel>], iteration_bounds = array<i64: 1>, scalar_prefetch = 0 : i64, scratch_operands = 0 : i64, tpu.core_type = #tpu.core_type<tc>, window_params = [{transform_indices = @transform_0, window_bounds = array<i64: 2, 128>}, {pipeline_mode = #tpu.pipeline_mode<synchronous>, transform_indices = @transform_1, window_bounds = array<i64: 7, 32, 32>}, {pipeline_mode = #tpu.pipeline_mode<synchronous>, transform_indices = @transform_2, window_bounds = array<i64: 32, 7>}, {transform_indices = @transform_3, window_bounds = array<i64: 1, 128>}]} {
    %c0 = arith.constant 0 : index
    %c0_0 = arith.constant 0 : index
    %0 = vector.load %arg1[%c0, %c0_0] : memref<2x128xf32, #tpu.memory_space<vmem>>, vector<2x128xf32>
    %c0_1 = arith.constant 0 : index
    %c0_2 = arith.constant 0 : index
    %1 = vector.load %arg3[%c0_1, %c0_2] : memref<32x7xf32, #tpu.memory_space<vmem>>, vector<32x7xf32>
    %c0_3 = arith.constant 0 : index
    %c0_4 = arith.constant 0 : index
    %c0_5 = arith.constant 0 : index
    %2 = vector.load %arg2[%c0_3, %c0_4, %c0_5] : memref<7x32x32xbf16, #tpu.memory_space<vmem>>, vector<1x32x32xbf16>
    %3 = vector.shape_cast %2 : vector<1x32x32xbf16> to vector<32x32xbf16>
    %4 = vector.extract_strided_slice %3 {offsets = [0, 0], sizes = [32, 2], strides = [1, 1]} : vector<32x32xbf16> to vector<32x2xbf16>
    %5 = arith.extf %4 : vector<32x2xbf16> to vector<32x2xf32>
    %6 = vector.extract_strided_slice %5 {offsets = [0, 0], sizes = [32, 1], strides = [1, 1]} : vector<32x2xf32> to vector<32x1xf32>
    %7 = vector.extract_strided_slice %0 {offsets = [0, 0], sizes = [1, 128], strides = [1, 1]} : vector<2x128xf32> to vector<1x128xf32>
    %8 = vector.broadcast %6 : vector<32x1xf32> to vector<32x128xf32>
    %9 = vector.broadcast %7 : vector<1x128xf32> to vector<32x128xf32>
    %10 = arith.mulf %8, %9 : vector<32x128xf32>
    %11 = vector.extract_strided_slice %5 {offsets = [0, 1], sizes = [32, 1], strides = [1, 1]} : vector<32x2xf32> to vector<32x1xf32>
    %12 = vector.extract_strided_slice %0 {offsets = [1, 0], sizes = [1, 128], strides = [1, 1]} : vector<2x128xf32> to vector<1x128xf32>
    %13 = vector.broadcast %11 : vector<32x1xf32> to vector<32x128xf32>
    %14 = vector.broadcast %12 : vector<1x128xf32> to vector<32x128xf32>
    %15 = arith.mulf %13, %14 : vector<32x128xf32>
    %16 = arith.addf %10, %15 : vector<32x128xf32>
    %17 = vector.extract_strided_slice %1 {offsets = [0, 0], sizes = [32, 1], strides = [1, 1]} : vector<32x7xf32> to vector<32x1xf32>
    %18 = vector.broadcast %17 : vector<32x1xf32> to vector<32x128xf32>
    %19 = arith.addf %16, %18 : vector<32x128xf32>
    %cst = arith.constant 0.000000e+00 : f32
    %20 = vector.broadcast %cst : f32 to vector<32x128xf32>
    %21 = arith.maximumf %19, %20 : vector<32x128xf32>
    %22 = arith.truncf %21 : vector<32x128xf32> to vector<32x128xbf16>
    %c1 = arith.constant 1 : index
    %c0_6 = arith.constant 0 : index
    %c0_7 = arith.constant 0 : index
    %23 = vector.load %arg2[%c1, %c0_6, %c0_7] : memref<7x32x32xbf16, #tpu.memory_space<vmem>>, vector<1x32x32xbf16>
    %24 = vector.shape_cast %23 : vector<1x32x32xbf16> to vector<32x32xbf16>
    %cst_8 = arith.constant dense<0.000000e+00> : vector<32x128xf32>
    %25 = tpu.matmul %24, %22, %cst_8 {dimension_numbers = #tpu.dot_dimension_numbers<[1], [0], [0], [1], [0, 0, 1, 1], [], []>} : vector<32x32xbf16>, vector<32x128xbf16>, vector<32x128xf32> -> vector<32x128xf32>
    %26 = vector.extract_strided_slice %1 {offsets = [0, 1], sizes = [32, 1], strides = [1, 1]} : vector<32x7xf32> to vector<32x1xf32>
    %27 = arith.truncf %26 : vector<32x1xf32> to vector<32x1xbf16>
    %28 = arith.truncf %25 : vector<32x128xf32> to vector<32x128xbf16>
    %29 = vector.broadcast %27 : vector<32x1xbf16> to vector<32x128xbf16>
    %30 = arith.addf %28, %29 : vector<32x128xbf16>
    %cst_9 = arith.constant 0.000000e+00 : bf16
    %31 = vector.broadcast %cst_9 : bf16 to vector<32x128xbf16>
    %32 = arith.maximumf %30, %31 : vector<32x128xbf16>
    %c2 = arith.constant 2 : index
    %c0_10 = arith.constant 0 : index
    %c0_11 = arith.constant 0 : index
    %33 = vector.load %arg2[%c2, %c0_10, %c0_11] : memref<7x32x32xbf16, #tpu.memory_space<vmem>>, vector<1x32x32xbf16>
    %34 = vector.shape_cast %33 : vector<1x32x32xbf16> to vector<32x32xbf16>
    %cst_12 = arith.constant dense<0.000000e+00> : vector<32x128xf32>
    %35 = tpu.matmul %34, %32, %cst_12 {dimension_numbers = #tpu.dot_dimension_numbers<[1], [0], [0], [1], [0, 0, 1, 1], [], []>} : vector<32x32xbf16>, vector<32x128xbf16>, vector<32x128xf32> -> vector<32x128xf32>
    %36 = vector.extract_strided_slice %1 {offsets = [0, 2], sizes = [32, 1], strides = [1, 1]} : vector<32x7xf32> to vector<32x1xf32>
    %37 = arith.truncf %36 : vector<32x1xf32> to vector<32x1xbf16>
    %38 = arith.truncf %35 : vector<32x128xf32> to vector<32x128xbf16>
    %39 = vector.broadcast %37 : vector<32x1xbf16> to vector<32x128xbf16>
    %40 = arith.addf %38, %39 : vector<32x128xbf16>
    %cst_13 = arith.constant 0.000000e+00 : bf16
    %41 = vector.broadcast %cst_13 : bf16 to vector<32x128xbf16>
    %42 = arith.maximumf %40, %41 : vector<32x128xbf16>
    %c3 = arith.constant 3 : index
    %c0_14 = arith.constant 0 : index
    %c0_15 = arith.constant 0 : index
    %43 = vector.load %arg2[%c3, %c0_14, %c0_15] : memref<7x32x32xbf16, #tpu.memory_space<vmem>>, vector<1x32x32xbf16>
    %44 = vector.shape_cast %43 : vector<1x32x32xbf16> to vector<32x32xbf16>
    %cst_16 = arith.constant dense<0.000000e+00> : vector<32x128xf32>
    %45 = tpu.matmul %44, %42, %cst_16 {dimension_numbers = #tpu.dot_dimension_numbers<[1], [0], [0], [1], [0, 0, 1, 1], [], []>} : vector<32x32xbf16>, vector<32x128xbf16>, vector<32x128xf32> -> vector<32x128xf32>
    %46 = vector.extract_strided_slice %1 {offsets = [0, 3], sizes = [32, 1], strides = [1, 1]} : vector<32x7xf32> to vector<32x1xf32>
    %47 = arith.truncf %46 : vector<32x1xf32> to vector<32x1xbf16>
    %48 = arith.truncf %45 : vector<32x128xf32> to vector<32x128xbf16>
    %49 = vector.broadcast %47 : vector<32x1xbf16> to vector<32x128xbf16>
    %50 = arith.addf %48, %49 : vector<32x128xbf16>
    %cst_17 = arith.constant 0.000000e+00 : bf16
    %51 = vector.broadcast %cst_17 : bf16 to vector<32x128xbf16>
    %52 = arith.maximumf %50, %51 : vector<32x128xbf16>
    %c4 = arith.constant 4 : index
    %c0_18 = arith.constant 0 : index
    %c0_19 = arith.constant 0 : index
    %53 = vector.load %arg2[%c4, %c0_18, %c0_19] : memref<7x32x32xbf16, #tpu.memory_space<vmem>>, vector<1x32x32xbf16>
    %54 = vector.shape_cast %53 : vector<1x32x32xbf16> to vector<32x32xbf16>
    %cst_20 = arith.constant dense<0.000000e+00> : vector<32x128xf32>
    %55 = tpu.matmul %54, %52, %cst_20 {dimension_numbers = #tpu.dot_dimension_numbers<[1], [0], [0], [1], [0, 0, 1, 1], [], []>} : vector<32x32xbf16>, vector<32x128xbf16>, vector<32x128xf32> -> vector<32x128xf32>
    %56 = vector.extract_strided_slice %1 {offsets = [0, 4], sizes = [32, 1], strides = [1, 1]} : vector<32x7xf32> to vector<32x1xf32>
    %57 = arith.truncf %56 : vector<32x1xf32> to vector<32x1xbf16>
    %58 = arith.truncf %55 : vector<32x128xf32> to vector<32x128xbf16>
    %59 = vector.broadcast %57 : vector<32x1xbf16> to vector<32x128xbf16>
    %60 = arith.addf %58, %59 : vector<32x128xbf16>
    %cst_21 = arith.constant 0.000000e+00 : bf16
    %61 = vector.broadcast %cst_21 : bf16 to vector<32x128xbf16>
    %62 = arith.maximumf %60, %61 : vector<32x128xbf16>
    %c5 = arith.constant 5 : index
    %c0_22 = arith.constant 0 : index
    %c0_23 = arith.constant 0 : index
    %63 = vector.load %arg2[%c5, %c0_22, %c0_23] : memref<7x32x32xbf16, #tpu.memory_space<vmem>>, vector<1x32x32xbf16>
    %64 = vector.shape_cast %63 : vector<1x32x32xbf16> to vector<32x32xbf16>
    %cst_24 = arith.constant dense<0.000000e+00> : vector<32x128xf32>
    %65 = tpu.matmul %64, %62, %cst_24 {dimension_numbers = #tpu.dot_dimension_numbers<[1], [0], [0], [1], [0, 0, 1, 1], [], []>} : vector<32x32xbf16>, vector<32x128xbf16>, vector<32x128xf32> -> vector<32x128xf32>
    %66 = vector.extract_strided_slice %1 {offsets = [0, 5], sizes = [32, 1], strides = [1, 1]} : vector<32x7xf32> to vector<32x1xf32>
    %67 = arith.truncf %66 : vector<32x1xf32> to vector<32x1xbf16>
    %68 = arith.truncf %65 : vector<32x128xf32> to vector<32x128xbf16>
    %69 = vector.broadcast %67 : vector<32x1xbf16> to vector<32x128xbf16>
    %70 = arith.addf %68, %69 : vector<32x128xbf16>
    %cst_25 = arith.constant 0.000000e+00 : bf16
    %71 = vector.broadcast %cst_25 : bf16 to vector<32x128xbf16>
    %72 = arith.maximumf %70, %71 : vector<32x128xbf16>
    %c6 = arith.constant 6 : index
    %c0_26 = arith.constant 0 : index
    %c0_27 = arith.constant 0 : index
    %73 = vector.load %arg2[%c6, %c0_26, %c0_27] : memref<7x32x32xbf16, #tpu.memory_space<vmem>>, vector<1x32x32xbf16>
    %74 = vector.shape_cast %73 : vector<1x32x32xbf16> to vector<32x32xbf16>
    %75 = vector.extract_strided_slice %74 {offsets = [0, 0], sizes = [1, 32], strides = [1, 1]} : vector<32x32xbf16> to vector<1x32xbf16>
    %cst_28 = arith.constant dense<0.000000e+00> : vector<1x128xf32>
    %76 = tpu.matmul %75, %72, %cst_28 {dimension_numbers = #tpu.dot_dimension_numbers<[1], [0], [0], [1], [0, 0, 1, 1], [], []>} : vector<1x32xbf16>, vector<32x128xbf16>, vector<1x128xf32> -> vector<1x128xf32>
    %77 = vector.extract_strided_slice %1 {offsets = [0, 6], sizes = [1, 1], strides = [1, 1]} : vector<32x7xf32> to vector<1x1xf32>
    %78 = vector.broadcast %77 : vector<1x1xf32> to vector<1x128xf32>
    %79 = arith.addf %76, %78 : vector<1x128xf32>
    %c0_29 = arith.constant 0 : index
    %c0_30 = arith.constant 0 : index
    %80 = vector.load %arg4[%c0_29, %c0_30] : memref<1x128xf32, #tpu.memory_space<vmem>>, vector<1x128xf32>
    tpu.vector_store %arg4[%c0_29, %c0_30], %79 {strides = array<i32>} : memref<1x128xf32, #tpu.memory_space<vmem>>, vector<1x128xf32>,
    return
  }
  func.func @transform_0(%arg0: i32) -> (i32, i32) {
    %c0_i32 = arith.constant 0 : i32
    %c0_i32_0 = arith.constant 0 : i32
    return %c0_i32, %arg0 : i32, i32
  }
  func.func @transform_1(%arg0: i32) -> (i32, i32, i32) {
    %c0_i32 = arith.constant 0 : i32
    %c0_i32_0 = arith.constant 0 : i32
    %c0_i32_1 = arith.constant 0 : i32
    %c0_i32_2 = arith.constant 0 : i32
    return %c0_i32, %c0_i32_0, %c0_i32_1 : i32, i32, i32
  }
  func.func @transform_2(%arg0: i32) -> (i32, i32) {
    %c0_i32 = arith.constant 0 : i32
    %c0_i32_0 = arith.constant 0 : i32
    %c0_i32_1 = arith.constant 0 : i32
    return %c0_i32, %c0_i32_0 : i32, i32
  }
  func.func @transform_3(%arg0: i32) -> (i32, i32) {
    %c0_i32 = arith.constant 0 : i32
    %c0_i32_0 = arith.constant 0 : i32
    return %c0_i32, %arg0 : i32, i32
  }
}

</mosaic_0001>

<bundles_post_ra>
// kernel: tpu_custom_call.1
= control target key start
LH: loop header
LB: loop body
LE: loop exit
PB: predicated region body
PF: predicated region fallthrough
CT: control target
= control target key end

     0   :  { %8 = vsyncpa [#allocation3], 0  ;;  %s944_s0 = inlined_call_operand.vmem [shape: f32[2,128], index: 0, kind: input, shape index: {}]   ;;  %s945_s1 = inlined_call_operand.hbm [shape: bf16[7,32,32], index: 1, kind: input, shape index: {}]   ;;  %s946_s2 = inlined_call_operand.vmem [shape: f32[32,7], index: 2, kind: input, shape index: {}]   ;;  %s947_s3 = inlined_call_operand.hbm [shape: f32[1,128], index: 3, kind: output, shape index: {}]  }
   0x1   :  { %9 = vsyncpa [#allocation4], 0  ;;  %s828_s12 = smov [#allocation2]   ;;  %s780_s16 = scalar_lea.hbm %s945_s1, 1792 }
   0x2   :  { %s17_s13 = sshll.u32 %s828_s12, 4  ;;  %p781_p0 = scmp.ne.s32.totalorder %s945_s1, %s780_s16  ;;  %s18_s13 = int_to_ptr.vmem [resolvable:$true] %s17_s13 }
   0x3   :  { %p784_p1 = scmp.lt.u32.totalorder %s780_s16, %s945_s1 }
   0x5   :  { %p786_p2 = pnand %p784_p1, %p781_p0 }
   0x7   :  { %789 = shalt.err (!%p786_p2)
}
   0x8   :  { %s790_s21 = scalar_lea.vmem %s18_s13, 1792  ;;  %p795_p4 = scmp.lt.s32.totalorder %s18_s13, %s18_s13 }
   0x9   :  { %p791_p3 = scmp.ne.s32.totalorder %s18_s13, %s790_s21  ;;  %p796_p5 = scmp.lt.s32.totalorder %s790_s21, %s790_s21 }
   0xb   :  { %p797_p6 = por %p796_p5, %p795_p4 }
   0xd   :  { %p798_p7 = pnand %p797_p6, %p791_p3 }
   0xf   :  { %801 = shalt.err (!%p798_p7)
}
  0x10   :  { %s829_s22 = smov 64   ;;  %s830_s23 = smov 4  }
  0x11   :  { %23 = dma.hbm_to_vmem [thread:$0]  %s945_s1, 1792, %s18_s13, [#allocation3], %s829_s22, %s829_s22, %s830_s23  }
  0x12   :  { %824 = dma.done.wait [#allocation3], 1792  }
  0x13   :  { %825 = vsyncadd [#allocation3], 4294965504  ;;  %v831_v0 = vmov 0   ;;  %v878_v1 = vld [vmem:[%s946_s2] sm:$0xff]  ;;  %v648_v3 = vld [vmem:[#allocation2 + $0x8] sm:$0xff]   ;;  %v832_v10 = vmov 1   ;;  %v63_v17 = vlaneseq }
  0x14   :  { %733 = vset.pattern.permute.xlu1 %v831_v0  ;;  %734 = vset.pattern.permute.xlu0 %v831_v0  ;;  %v641_v2 = vld [vmem:[#allocation2] sm:$0xff]   ;;  %v646_v6 = vunpack.c.l.bf16 %v648_v3  ;;  %v647_v7 = vunpack.c.h.bf16 %v648_v3  ;;  %v33_v11 = vld [vmem:[%s946_s2 + $0x10] sm:$0xff]  ;;  %v32_v12 = vld [vmem:[%s946_s2 + $0x8] sm:$0xff]  ;;  %vm144_vm0 = vcmask 261120   ;;  %vm838_vm1 = vmmov 0  }
  0x15   :  { %101 = vperm.xlu1 %733, %v878_v1   ;;  %v642_v4 = vunpack.c.l.bf16 %v641_v2  ;;  %v643_v5 = vunpack.c.h.bf16 %v641_v2  ;;  %v890_v13 = vpack.c.bf16 %v32_v12, %v878_v1  ;;  %v34_v14 = vld [vmem:[%s946_s2 + $0x18] sm:$0xff]  ;;  %v770_v16 = vld [vmem:[#allocation2 + $0x10] sm:$0xff]   ;;  %v64_v18 = vshrl.u32 %v63_v17, 7  ;;  %v30_v22 = vld [vmem:[%s944_s0] sm:$0x3]  ;;  %s840_s0 = smov [#allocation5]  }
  0x16   :  { %v747_v9 = vpack.i.bf16 %v647_v7, %v646_v6  ;;  %v895_v15 = vpack.c.bf16 %v34_v14, %v33_v11  ;;  %676 = vmatprep.mubr.msk.bf16.mxu0 %vm144_vm0, %v770_v16  ;;  %v771_v62 = vld [vmem:[#allocation2 + $0x18] sm:$0xff]   ;;  %v772_v63 = vld [vmem:[#allocation2 + $0x20] sm:$0xff]   ;;  %v833_v2 = vmov 2   ;;  %v773_v17 = vld [vmem:[#allocation2 + $0x28] sm:$0xff]   ;;  %s610_s7 = sshll.u32 %s840_s0, 4  ;;  %s611_s7 = int_to_ptr.vmem [resolvable:$true] %s610_s7 }
  0x17   :  { %v735_v8 = vpack.i.bf16 %v643_v5, %v642_v4  ;;  %v65_v20 = vsub.s32 0, %v64_v18  ;;  %v89_v24 = vsub.s32 1, %v64_v18  ;;  %684 = vmatprep.mubr.msk.bf16.mxu1 %vm144_vm0, %v772_v63  ;;  %v774_v18 = vld [vmem:[#allocation2 + $0x30] sm:$0xff]   ;;  %s802_s8 = scalar_lea.vmem %s611_s7, 16  ;;  %s806_s9 = scalar_lea.vmem %s611_s7, 32 }
  0x18   :  { %p803_p8 = scmp.ne.s32.totalorder %s611_s7, %s802_s8  ;;  %p807_p9 = scmp.lt.s32.totalorder %s611_s7, %s611_s7 }
  0x19   :  { %736 = vperm.xlu0 %734, %v735_v8   ;;  %748 = vperm.xlu1 %733, %v747_v9   ;;  %v66_v27 = vrot.slane %v30_v22, %v65_v20  ;;  %v90_v29 = vrot.slane %v30_v22, %v89_v24  ;;  %p808_p10 = scmp.lt.s32.totalorder %s806_s9, %s802_s8 }
  0x1b   :  { %p809_p11 = por %p808_p10, %p807_p9 }
  0x1d   :  { %740 = vset.pattern.permute.xlu0 %v832_v10  ;;  %752 = vset.pattern.permute.xlu1 %v832_v10  ;;  %p810_p12 = pnand %p809_p11, %p803_p8 }
  0x1e   :  { %742 = vperm.xlu0 %740, %v735_v8   ;;  %754 = vperm.xlu1 %752, %v747_v9  }
  0x22   :  { %758 = vset.pattern.permute.xlu1 %v831_v0  ;;  %746 = vset.pattern.permute.xlu0 %v831_v0 }
  0x23   :  { %111 = vperm.xlu1 %758, %v33_v11   ;;  %106 = vperm.xlu0 %746, %v32_v12  }
  0x27   :  { %116 = vperm.xlu1 %758, %v34_v14   ;;  %759 = vset.pattern.permute.xlu0 %v832_v10 }
  0x28   :  { %206 = vperm.xlu0 %759, %v890_v13  }
  0x2b   :  { %760 = vset.pattern.permute.xlu1 %v832_v10 }
  0x2c   :  { %211 = vperm.xlu1 %760, %v895_v15   ;;  %762 = vset.pattern.permute.xlu0 %v833_v2 }
  0x2d   :  { %295 = vperm.xlu0 %762, %v895_v15  }
  0x30   :  { %761 = vset.pattern.permute.xlu1 %v833_v2 }
  0x31   :  { %291 = vperm.xlu1 %761, %v890_v13  }
  0x94   :  { %v102_v19 = vpop.permute.xlu1 %101 }
  0x98   :  { %v737_v21 = vpop.permute.xlu0 %736  ;;  %v749_v23 = vpop.permute.xlu1 %748 }
  0x99   :  { %v739_v25 = vunpack.i.h.bf16 %v737_v21  ;;  %v738_v26 = vunpack.i.l.bf16 %v737_v21  ;;  %v750_v28 = vunpack.i.l.bf16 %v749_v23  ;;  %v751_v38 = vunpack.i.h.bf16 %v749_v23 }
  0x9b   :  { %v67_v36 = vmul.f32 %v738_v26, %v66_v27  ;;  %v68_v37 = vmul.f32 %v739_v25, %v66_v27  ;;  %v69_v39 = vmul.f32 %v750_v28, %v66_v27  ;;  %v70_v49 = vmul.f32 %v751_v38, %v66_v27 }
  0x9d   :  { %v743_v30 = vpop.permute.xlu0 %742  ;;  %v755_v31 = vpop.permute.xlu1 %754 }
  0x9e   :  { %v745_v32 = vunpack.i.h.bf16 %v743_v30  ;;  %v744_v33 = vunpack.i.l.bf16 %v743_v30  ;;  %v757_v34 = vunpack.i.h.bf16 %v755_v31  ;;  %v756_v35 = vunpack.i.l.bf16 %v755_v31 }
  0xa0   :  { %v91_v40 = vmul.f32 %v744_v33, %v90_v29  ;;  %v92_v41 = vmul.f32 %v745_v32, %v90_v29  ;;  %v93_v42 = vmul.f32 %v756_v35, %v90_v29  ;;  %v94_v43 = vmul.f32 %v757_v34, %v90_v29  ;;  %v775_v32 = vld [vmem:[#allocation2 + $0x38] sm:$0xff]   ;;  %v776_v33 = vld [vmem:[#allocation2 + $0x40] sm:$0xff]  }
  0xa1   :  { %v835_v34 = vmov 4  }
  0xa2   :  { %v95_v44 = vadd.f32 %v91_v40, %v67_v36  ;;  %v112_v45 = vpop.permute.xlu1 %111  ;;  %v97_v46 = vadd.f32 %v93_v42, %v69_v39  ;;  %v107_v47 = vpop.permute.xlu0 %106  ;;  %v96_v48 = vadd.f32 %v92_v41, %v68_v37  ;;  %v98_v53 = vadd.f32 %v94_v43, %v70_v49  ;;  %764 = vset.pattern.permute.xlu0 %v835_v34 }
  0xa3   :  { %459 = vperm.xlu0 %764, %v890_v13   ;;  %v836_v49 = vmov 5  }
  0xa4   :  { %v120_v50 = vadd.f32 %v107_v47, %v96_v48  ;;  %v119_v51 = vadd.f32 %v102_v19, %v95_v44  ;;  %v121_v52 = vadd.f32 %v112_v45, %v97_v46  ;;  %v834_v19 = vmov 3   ;;  %v777_v47 = vld [vmem:[#allocation2 + $0x48] sm:$0xff]   ;;  %v778_v48 = vld [vmem:[#allocation2 + $0x50] sm:$0xff]  }
  0xa5   :  { %763 = vset.pattern.permute.xlu1 %v834_v19 }
  0xa6   :  { %v124_v54 = vmax.f32 %v120_v50, 0.0  ;;  %v117_v55 = vpop.permute.xlu1 %116  ;;  %v123_v56 = vmax.f32 %v119_v51, 0.0  ;;  %v125_v59 = vmax.f32 %v121_v52, 0.0  ;;  %375 = vperm.xlu1 %763, %v890_v13  }
  0xa7   :  { %v122_v57 = vadd.f32 %v117_v55, %v98_v53  ;;  %v207_v9 = vpop.permute.xlu0 %206  ;;  %767 = vset.pattern.permute.xlu0 %v836_v49 }
  0xa8   :  { %v127_v58 = vpack.c.bf16 %v124_v54, %v123_v56  ;;  %547 = vperm.xlu0 %767, %v895_v15  }
  0xa9   :  { %v126_v60 = vmax.f32 %v122_v57, 0.0 }
  0xaa   :  { %672 = vmatprep.subr.bf16.mxu0 %v127_v58  ;;  %379 = vperm.xlu1 %763, %v895_v15  }
  0xab   :  { %v128_v61 = vpack.c.bf16 %v126_v60, %v125_v59  ;;  %673 = vmatpush3.bf16.msra.mxu0 %v127_v58  ;;  %v212_v6 = vpop.permute.xlu1 %211 }
  0xac   :  { %v296_v23 = vpop.permute.xlu0 %295 }
  0xad   :  { %674 = vmatprep.subr.bf16.mxu0 %v128_v61 }
  0xae   :  { %765 = vset.pattern.permute.xlu1 %v835_v34 }
  0xaf   :  { %675 = vmatpush3.bf16.msra.mxu0 %v128_v61  ;;  %463 = vperm.xlu1 %765, %v895_v15   ;;  %v779_v15 = vld [vmem:[#allocation2 + $0x58] sm:$0xff]  }
  0xb0   :  { %v292_v26 = vpop.permute.xlu1 %291 }
  0xb2   :  { %677 = vmatmul.mubr.msk.bf16.vlgmr.msra.gmra.mrb[0].mxu0 %vm144_vm0, %v771_v62  ;;  %v839_v62 = vmov 6  }
  0xb3   :  { %692 = vmatprep.mubr.msk.bf16.mxu0 %vm144_vm0, %v774_v18  ;;  %766 = vset.pattern.permute.xlu1 %v836_v49 }
  0xb4   :  { %543 = vperm.xlu1 %766, %v890_v13   ;;  %v837_v13 = vmov 0.0   ;;  %769 = vset.pattern.permute.xlu0 %v839_v62 }
  0xb8   :  { %768 = vset.pattern.permute.xlu1 %v839_v62 }
  0xb9   :  { %557 = vperm.xlu1 %768, %v878_v1  }
 0x122   :  { %v460_v56 = vpop.permute.xlu0 %459 }
 0x125   :  { %v376_v35 = vpop.permute.xlu1 %375 }
 0x129   :  { %v380_v41 = vpop.permute.xlu1 %379 }
 0x12e   :  { %v464_v53 = vpop.permute.xlu1 %463 }
 0x185   :  { %v678_v3 = vpop.f32.mrb[0].mxu0 }
 0x186   :  { %v185_v4 = vpop.f32.mrb[1].mxu0 }
 0x187   :  { %v679_v5 = vpop.f32.mrb[2].mxu0 }
 0x188   :  { %v203_v7 = vpack.c.bf16 %v679_v5, %v678_v3  ;;  %v188_v8 = vpop.f32.mrb[3].mxu0 }
 0x189   :  { %v202_v10 = vpack.c.bf16 %v188_v8, %v185_v4  ;;  %v548_v8 = vpop.permute.xlu0 %547 }
 0x18a   :  { %v215_v11 = vadd.bf16 %v212_v6, %v203_v7  ;;  %v544_v6 = vpop.permute.xlu1 %543 }
 0x18b   :  { %v214_v12 = vadd.bf16 %v207_v9, %v202_v10 }
 0x18c   :  { %v217_v16 = vmax.bf16 %v831_v0, %v215_v11 }
 0x18d   :  { %v216_v14 = vmax.bf16 %v831_v0, %v214_v12 }
 0x18e   :  { %v558_v1 = vpop.permute.xlu1 %557 }
 0x18f   :  { %680 = vmatprep.subr.bf16.mxu1 %v216_v14 }
 0x190   :  { %681 = vmatpush3.bf16.msra.mxu1 %v216_v14  ;;  %v555_v14 = vld [vmem:[#allocation2 + $0x60] sm:$0xf] }
 0x191   :  { %682 = vmatprep.subr.bf16.mxu1 %v217_v16 }
 0x194   :  { %683 = vmatpush3.bf16.msra.mxu1 %v217_v16 }
 0x197   :  { %685 = vmatmul.mubr.msk.bf16.vlgmr.msra.gmra.mrb[0].mxu1 %vm144_vm0, %v773_v17 }
 0x198   :  { %700 = vmatprep.mubr.msk.bf16.mxu1 %vm144_vm0, %v776_v33 }
 0x26a   :  { %v686_v20 = vpop.f32.mrb[0].mxu1 }
 0x26b   :  { %v273_v21 = vpop.f32.mrb[1].mxu1 }
 0x26c   :  { %v687_v22 = vpop.f32.mrb[2].mxu1 }
 0x26d   :  { %v289_v24 = vpack.c.bf16 %v687_v22, %v686_v20  ;;  %v276_v25 = vpop.f32.mrb[3].mxu1 }
 0x26e   :  { %v288_v27 = vpack.c.bf16 %v276_v25, %v273_v21 }
 0x26f   :  { %v299_v28 = vadd.bf16 %v296_v23, %v289_v24 }
 0x270   :  { %v298_v29 = vadd.bf16 %v292_v26, %v288_v27 }
 0x271   :  { %v301_v31 = vmax.bf16 %v831_v0, %v299_v28 }
 0x272   :  { %v300_v30 = vmax.bf16 %v831_v0, %v298_v29 }
 0x274   :  { %688 = vmatprep.subr.bf16.mxu0 %v300_v30 }
 0x275   :  { %689 = vmatpush3.bf16.msra.mxu0 %v300_v30 }
 0x276   :  { %690 = vmatprep.subr.bf16.mxu0 %v301_v31 }
 0x279   :  { %691 = vmatpush3.bf16.msra.mxu0 %v301_v31 }
 0x27c   :  { %693 = vmatmul.mubr.msk.bf16.vlgmr.msra.gmra.mrb[4].mxu0 %vm144_vm0, %v775_v32 }
 0x27d   :  { %708 = vmatprep.mubr.msk.bf16.mxu0 %vm144_vm0, %v778_v48 }
 0x34f   :  { %v694_v36 = vpop.f32.mrb[4].mxu0 }
 0x350   :  { %v357_v37 = vpop.f32.mrb[5].mxu0 }
 0x351   :  { %v695_v38 = vpop.f32.mrb[6].mxu0 }
 0x352   :  { %v373_v39 = vpack.c.bf16 %v695_v38, %v694_v36  ;;  %v360_v40 = vpop.f32.mrb[7].mxu0 }
 0x353   :  { %v372_v42 = vpack.c.bf16 %v360_v40, %v357_v37 }
 0x354   :  { %v383_v44 = vadd.bf16 %v380_v41, %v373_v39 }
 0x355   :  { %v382_v43 = vadd.bf16 %v376_v35, %v372_v42 }
 0x356   :  { %v385_v46 = vmax.bf16 %v831_v0, %v383_v44 }
 0x357   :  { %v384_v45 = vmax.bf16 %v831_v0, %v382_v43 }
 0x359   :  { %696 = vmatprep.subr.bf16.mxu1 %v384_v45 }
 0x35a   :  { %697 = vmatpush3.bf16.msra.mxu1 %v384_v45 }
 0x35b   :  { %698 = vmatprep.subr.bf16.mxu1 %v385_v46 }
 0x35e   :  { %699 = vmatpush3.bf16.msra.mxu1 %v385_v46 }
 0x35f   :  { %712 = vmatprep.subr.bf16.mxu1 %v837_v13 }
 0x361   :  { %701 = vmatmul.mubr.msk.bf16.vlgmr.msra.gmra.mrb[4].mxu1 %vm144_vm0, %v777_v47 }
 0x362   :  { %716 = vmatprep.mubr.msk.bf16.mxu1 %vm838_vm1, %v837_v13 }
 0x434   :  { %v702_v50 = vpop.f32.mrb[4].mxu1 }
 0x435   :  { %v441_v51 = vpop.f32.mrb[5].mxu1 }
 0x436   :  { %v703_v52 = vpop.f32.mrb[6].mxu1 }
 0x437   :  { %v457_v54 = vpack.c.bf16 %v703_v52, %v702_v50  ;;  %v444_v55 = vpop.f32.mrb[7].mxu1 }
 0x438   :  { %v456_v57 = vpack.c.bf16 %v444_v55, %v441_v51 }
 0x439   :  { %v467_v58 = vadd.bf16 %v464_v53, %v457_v54 }
 0x43a   :  { %v466_v59 = vadd.bf16 %v460_v56, %v456_v57 }
 0x43b   :  { %v469_v61 = vmax.bf16 %v831_v0, %v467_v58 }
 0x43c   :  { %v468_v60 = vmax.bf16 %v831_v0, %v466_v59 }
 0x43e   :  { %704 = vmatprep.subr.bf16.mxu0 %v468_v60 }
 0x43f   :  { %705 = vmatpush3.bf16.msra.mxu0 %v468_v60 }
 0x440   :  { %706 = vmatprep.subr.bf16.mxu0 %v469_v61 }
 0x443   :  { %707 = vmatpush3.bf16.msra.mxu0 %v469_v61 }
 0x446   :  { %709 = vmatmul.mubr.msk.bf16.vlgmr.msra.gmra.mrb[8].mxu0 %vm144_vm0, %v779_v15 }
 0x519   :  { %v710_v63 = vpop.f32.mrb[8].mxu0 }
 0x51a   :  { %v525_v2 = vpop.f32.mrb[9].mxu0 }
 0x51b   :  { %v711_v3 = vpop.f32.mrb[10].mxu0 }
 0x51c   :  { %v541_v4 = vpack.c.bf16 %v711_v3, %v710_v63  ;;  %v528_v5 = vpop.f32.mrb[11].mxu0 }
 0x51d   :  { %v540_v7 = vpack.c.bf16 %v528_v5, %v525_v2 }
 0x51e   :  { %v551_v10 = vadd.bf16 %v548_v8, %v541_v4 }
 0x51f   :  { %v550_v9 = vadd.bf16 %v544_v6, %v540_v7 }
 0x520   :  { %v553_v12 = vmax.bf16 %v831_v0, %v551_v10 }
 0x521   :  { %v552_v11 = vmax.bf16 %v831_v0, %v550_v9 }
 0x523   :  { %713 = vmatpush3.bf16.msra.mxu1 %v552_v11 }
 0x524   :  { %714 = vmatprep.subr.bf16.mxu1 %v837_v13 }
 0x527   :  { %715 = vmatpush3.bf16.msra.mxu1 %v553_v12 }
 0x52a   :  { %717 = vmatmul.mubr.msk.bf16.vlgmr.msra.gmra.mrb[8].mxu1 %vm144_vm0, %v555_v14 }
 0x5fd   :  { %v597_v16 = vpop.f32.mrb[8].mxu1 }
 0x5fe   :  { %v598_v17 = vadd.f32 %v597_v16, %v558_v1  ;;  %v718_v18 = vpop.f32.mrb[9].mxu1 }
 0x5ff   :  { %v600_v19 = vpop.f32.mrb[10].mxu1 }
 0x600   :  { %603 = vst [vmem:[#allocation5] sm:$0x1] %v598_v17  ;;  %v719_v20 = vpop.f32.mrb[11].mxu1 }
 0x601   :  { %813 = shalt.err (!%p810_p12)
}
 0x602   :  { %s814_s12 = scalar_lea.hbm %s947_s3, 16 }
 0x603   :  { %p815_p13 = scmp.ne.s32.totalorder %s947_s3, %s814_s12  ;;  %p818_p0 = scmp.lt.u32.totalorder %s814_s12, %s947_s3 }
 0x605   :  { %p820_p1 = pnand %p818_p0, %p815_p13 }
 0x607   :  { %823 = shalt.err (!%p820_p1)
}
 0x608   :  { %613 = dma.vmem_to_hbm [thread:$0]  %s611_s7, 16, %s947_s3, [#allocation4]  }
 0x609   :  { %826 = dma.done.wait [#allocation4], 16  }
 0x60a   :  { %827 = vsyncadd [#allocation4], 4294967280 }
 0x60b   :  { %617 = vsyncpa [#allocation3], 1 }
 0x60c   :  { %618 = vsyncpa [#allocation4], 1 }

</bundles_post_ra>
